<compile_context>
chip_gen: v5e
topology: v5e:2x2
jax: 0.10.0
libtpu: 0.0.40
codegen_flags: <defaults>
</compile_context>

<pallas_src>
import jax
import jax.numpy as jnp
from jax import lax
from jax.experimental import pallas as pl
from jax.experimental.pallas import tpu as pltpu


# ---------------------------------------------------------------- helpers

def _silu(x):
    return x * jax.nn.sigmoid(x)


def _layernorm(x, gamma, beta, eps=1e-5):
    """nn.LayerNorm over the last axis (biased variance, eps=1e-5)."""
    mu = jnp.mean(x, axis=-1, keepdims=True)
    var = jnp.mean((x - mu) ** 2, axis=-1, keepdims=True)
    return (x - mu) * lax.rsqrt(var + eps) * gamma + beta


def _row_stats(x, eps=1e-5):
    """Per-row mean and (unbiased variance + eps) over the feature axis,
    matching torch Tensor.var() defaults used by the standard AdaIN helper."""
    n = x.shape[-1]
    mean = jnp.mean(x, axis=-1, keepdims=True)
    var = jnp.sum((x - mean) ** 2, axis=-1, keepdims=True) / (n - 1)
    return mean, var + eps


# ---------------------------------------------------------------- kernel

def _mlp_adain_step_kernel(x_ref, emb_ref, style_ref,
                           wc_ref, bc_ref,
                           we_ref, w0_ref, b0_ref, w1_ref, vec_ref,
                           o_ref):
    """One (batch b, layer l) grid step of the MLPblock_adain stack.

    The output block index depends only on b, so the (S, D) f32 activation is
    carried in o_ref across the whole "arbitrary" layer axis without leaving
    VMEM; per-layer weight blocks (indexed by l) are prefetched by the
    standard double-buffered pipeline.
    """
    f32 = jnp.float32
    bf16 = jnp.bfloat16
    layer = pl.program_id(1)

    # ---- conct: Linear(2*dim -> dim) for the first block, Identity after ----
    @pl.when(layer == 0)
    def _():
        x0 = x_ref[0].astype(bf16)                              # (S, 2D)
        o_ref[0] = (jnp.dot(x0, wc_ref[...], preferred_element_type=f32)
                    + bc_ref[...])

    a_in = o_ref[0]                                             # (S, D) f32

    # ---- packed per-layer vectors: [emb bias, fc1 bias, g0, bt0, g1, bt1] ----
    vecs = vec_ref[0]                                           # (6, D) f32
    be, b1 = vecs[0:1, :], vecs[1:2, :]
    g0, bt0 = vecs[2:3, :], vecs[3:4, :]
    g1, bt1 = vecs[4:5, :], vecs[5:6, :]

    # ---- emb_fc(SiLU(embed)): one (1, D) x (D, D) matmul per layer ----
    emb = _silu(emb_ref[0])                                     # (1, D) f32
    emb_proj = (jnp.dot(emb.astype(bf16), we_ref[0],
                        preferred_element_type=f32) + be)       # (1, D)

    # ---- AdaIN (alpha == 1.0 is hard-coded in MLPblock_adain.forward) ----
    # TODO(synk): the repo's `adain` helper is not included in the spec; this
    # implements the standard AdaIN (per-position mean/std over the feature
    # axis, unbiased variance, eps=1e-5) -- same in the pure-JAX reference.
    s_mean, s_vare = _row_stats(style_ref[0])
    c_mean, c_vare = _row_stats(a_in)
    scale = lax.rsqrt(c_vare) * jnp.sqrt(s_vare)                # rsqrt -> EUP, no divide
    x = (a_in - c_mean) * scale + s_mean + emb_proj             # emb_proj bcasts over S

    # ---- norm0 -> fc0 (Conv1d(seq, seq, 1) == (S,S) matmul over seq) ----
    xn = _layernorm(x, g0, bt0)
    y = (jnp.dot(w0_ref[0], xn.astype(bf16), preferred_element_type=f32)
         + b0_ref[0])                                           # b0 (S,1) bcasts over D
    x = x + _silu(y)

    # ---- norm1 -> fc1 (Linear over dim) ----
    xn = _layernorm(x, g1, bt1)
    y = jnp.dot(xn.astype(bf16), w1_ref[0], preferred_element_type=f32) + b1
    x = x + _silu(y)

    o_ref[0] = x


# ---------------------------------------------------------------- wrapper

def _vmem_limit_bytes():
    """Generation-aware VMEM budget: ~3/4 of physical (48 MiB on v7x,
    96 MiB on v5e/v6e)."""
    try:
        cap = int(getattr(pltpu.get_tpu_info(), "vmem_capacity_bytes", 0))
    except Exception:
        cap = 0
    if cap <= 0:
        cap = 64 * 1024 * 1024
    return (cap // 4) * 3


def diffmlp_adain_forward(motion_input, embed, style_code, params):
    """DiffMLP_adain.forward: (motion_input, embed, style_code) -> motion feats.

    motion_input: (B, S, 2*D)   embed: (B, 1, D)   style_code: (B, S, D)
    """
    B, S, Din = motion_input.shape
    D = embed.shape[-1]
    L = params["we"].shape[0]

    in_specs = [
        pl.BlockSpec((1, S, Din), lambda b, l: (b, 0, 0)),      # motion_input
        pl.BlockSpec((1, 1, D),   lambda b, l: (b, 0, 0)),      # embed (no S-broadcast)
        pl.BlockSpec((1, S, D),   lambda b, l: (b, 0, 0)),      # style_code
        pl.BlockSpec((Din, D),    lambda b, l: (0, 0)),         # wc   (layer-0 conct)
        pl.BlockSpec((1, D),      lambda b, l: (0, 0)),         # bc
        pl.BlockSpec((1, D, D),   lambda b, l: (l, 0, 0)),      # we   per-layer
        pl.BlockSpec((1, S, S),   lambda b, l: (l, 0, 0)),      # w0   per-layer
        pl.BlockSpec((1, S, 1),   lambda b, l: (l, 0, 0)),      # b0   per-layer
        pl.BlockSpec((1, D, D),   lambda b, l: (l, 0, 0)),      # w1   per-layer
        pl.BlockSpec((1, 6, D),   lambda b, l: (l, 0, 0)),      # packed vectors
    ]
    # Same block for every l -> activation carried across the layer axis.
    out_spec = pl.BlockSpec((1, S, D), lambda b, l: (b, 0, 0))

    # Advisory cost estimate so XLA schedules the custom call sensibly.
    flops = (2 * B * S * Din * D                                 # conct (layer 0)
             + L * (2 * B * D * D                                # emb_fc
                    + 2 * B * S * S * D                          # fc0 (over seq)
                    + 2 * B * S * D * D))                        # fc1
    transcend = L * B * (D + 2 * S * D + 4 * S)
    nbytes = sum(int(a.size) * a.dtype.itemsize for a in
                 (motion_input, embed, style_code,
                  params["wc"], params["bc"], params["we"], params["w0"],
                  params["b0"], params["w1"], params["vecs"])) + B * S * D * 4

    out = pl.pallas_call(
        _mlp_adain_step_kernel,
        out_shape=jax.ShapeDtypeStruct((B, S, D), jnp.float32),
        grid=(B, L),
        in_specs=in_specs,
        out_specs=out_spec,
        compiler_params=pltpu.CompilerParams(
            dimension_semantics=("parallel", "arbitrary"),
            vmem_limit_bytes=_vmem_limit_bytes()),
        cost_estimate=pl.CostEstimate(flops=int(flops),
                                      transcendentals=int(transcend),
                                      bytes_accessed=int(nbytes)),
    )(motion_input, embed, style_code,
      params["wc"], params["bc"], params["we"], params["w0"],
      params["b0"], params["w1"], params["vecs"])
    return out


# ---------------------------------------------------------------- params

def init_params(key, *, dim, seq, num_layers):
    """Deterministic synthetic parameters. Linear weights are pre-transposed
    to (in, out), Conv1d weight to (out_ch, in_ch) = (seq, seq). Matmul
    weights are stored in bf16 (MXU-native on v6e/v7x, halves VMEM/HBM);
    biases and LayerNorm affine parameters stay f32."""
    L = num_layers
    ks = jax.random.split(key, 12)
    sc = 0.02
    f32, bf16 = jnp.float32, jnp.bfloat16
    be = sc * jax.random.normal(ks[3], (L, 1, dim), f32)
    b1 = sc * jax.random.normal(ks[7], (L, 1, dim), f32)
    g0 = 1.0 + 0.1 * jax.random.normal(ks[8], (L, 1, dim), f32)
    bt0 = 0.1 * jax.random.normal(ks[9], (L, 1, dim), f32)
    g1 = 1.0 + 0.1 * jax.random.normal(ks[10], (L, 1, dim), f32)
    bt1 = 0.1 * jax.random.normal(ks[11], (L, 1, dim), f32)
    return {
        "wc": (sc * jax.random.normal(ks[0], (2 * dim, dim), f32)).astype(bf16),
        "bc": sc * jax.random.normal(ks[1], (1, dim), f32),
        "we": (sc * jax.random.normal(ks[2], (L, dim, dim), f32)).astype(bf16),
        "w0": (sc * jax.random.normal(ks[4], (L, seq, seq), f32)).astype(bf16),
        "b0": sc * jax.random.normal(ks[5], (L, seq, 1), f32),
        "w1": (sc * jax.random.normal(ks[6], (L, dim, dim), f32)).astype(bf16),
        # packed per-layer vectors: [be, b1, g0, bt0, g1, bt1] -> (L, 6, dim)
        "vecs": jnp.concatenate([be, b1, g0, bt0, g1, bt1], axis=1),
    }


# ------------------------------------------------------- pure-JAX reference

def _dot_bf16(a, b):
    """Matmul with bf16 operands and f32 accumulation (mirrors the kernel)."""
    return jnp.dot(a.astype(jnp.bfloat16), b.astype(jnp.bfloat16),
                   preferred_element_type=jnp.float32)


def _ref_forward(motion_input, embed, style_code, params):
    f32 = jnp.float32
    L = params["we"].shape[0]
    vecs = params["vecs"]
    be, b1 = vecs[:, 0:1, :], vecs[:, 1:2, :]
    g0, bt0 = vecs[:, 2:3, :], vecs[:, 3:4, :]
    g1, bt1 = vecs[:, 4:5, :], vecs[:, 5:6, :]

    x = motion_input
    for i in range(L):
        emb_proj = _dot_bf16(_silu(embed), params["we"][i]) + be[i]     # (B,1,D)
        a_in = _dot_bf16(x, params["wc"]) + params["bc"] if i == 0 else x
        c_m, c_v = _row_stats(a_in)
        s_m, s_v = _row_stats(style_code)
        h = (a_in - c_m) * (lax.rsqrt(c_v) * jnp.sqrt(s_v)) + s_m + emb_proj
        hn = _layernorm(h, g0[i], bt0[i])
        y = jnp.einsum("os,bsd->bod", params["w0"][i],
                       hn.astype(jnp.bfloat16),
                       preferred_element_type=f32) + params["b0"][i]
        h = h + _silu(y)
        hn = _layernorm(h, g1[i], bt1[i])
        y = _dot_bf16(hn, params["w1"][i]) + b1[i]
        h = h + _silu(y)
        x = h
    return x


# ---------------------------------------------------------------- main

if __name__ == "__main__":
    # Small shapes consistent with DiffMLP_adain(latent_dim, seq, num_layers):
    DIM = 32          # latent_dim
    SEQ = 8           # seq
    NUM_LAYERS = 3    # num_layers
    B = 2             # batch

    key = jax.random.PRNGKey(0)
    k_in, k_emb, k_style, k_par = jax.random.split(key, 4)

    motion_input = jax.random.normal(k_in, (B, SEQ, 2 * DIM), jnp.float32)
    embed = jax.random.normal(k_emb, (B, 1, DIM), jnp.float32)
    style_code = jax.random.normal(k_style, (B, SEQ, DIM), jnp.float32)

    params = init_params(k_par, dim=DIM, seq=SEQ, num_layers=NUM_LAYERS)

    out = diffmlp_adain_forward(motion_input, embed, style_code, params)
    out = jax.block_until_ready(out)

    ref = _ref_forward(motion_input, embed, style_code, params)
    assert out.shape == (B, SEQ, DIM)
    assert jnp.allclose(out, ref, atol=1e-2, rtol=1e-2), "mismatch vs reference"

    print("KERNEL_OK")
</pallas_src>

<mosaic_0001>
module attributes {stable_mosaic.version = 11 : i64} {
  func.func @_mlp_adain_step_kernel(%arg0: i32, %arg1: i32, %arg2: memref<1x8x64xf32, #tpu.memory_space<vmem>>, %arg3: memref<1x1x32xf32, #tpu.memory_space<vmem>>, %arg4: memref<1x8x32xf32, #tpu.memory_space<vmem>>, %arg5: memref<64x32xbf16, #tpu.memory_space<vmem>>, %arg6: memref<1x32xf32, #tpu.memory_space<vmem>>, %arg7: memref<1x32x32xbf16, #tpu.memory_space<vmem>>, %arg8: memref<1x8x8xbf16, #tpu.memory_space<vmem>>, %arg9: memref<1x8x1xf32, #tpu.memory_space<vmem>>, %arg10: memref<1x32x32xbf16, #tpu.memory_space<vmem>>, %arg11: memref<1x6x32xf32, #tpu.memory_space<vmem>>, %arg12: memref<1x8x32xf32, #tpu.memory_space<vmem>>) attributes {dimension_semantics = [#tpu.dimension_semantics<parallel>, #tpu.dimension_semantics<arbitrary>], iteration_bounds = array<i64: 2, 3>, scalar_prefetch = 0 : i64, scratch_operands = 0 : i64, tpu.core_type = #tpu.core_type<tc>, window_params = [{transform_indices = @transform_0, window_bounds = array<i64: 1, 8, 64>}, {transform_indices = @transform_1, window_bounds = array<i64: 1, 1, 32>}, {transform_indices = @transform_2, window_bounds = array<i64: 1, 8, 32>}, {pipeline_mode = #tpu.pipeline_mode<synchronous>, transform_indices = @transform_3, window_bounds = array<i64: 64, 32>}, {pipeline_mode = #tpu.pipeline_mode<synchronous>, transform_indices = @transform_4, window_bounds = array<i64: 1, 32>}, {transform_indices = @transform_5, window_bounds = array<i64: 1, 32, 32>}, {transform_indices = @transform_6, window_bounds = array<i64: 1, 8, 8>}, {transform_indices = @transform_7, window_bounds = array<i64: 1, 8, 1>}, {transform_indices = @transform_8, window_bounds = array<i64: 1, 32, 32>}, {transform_indices = @transform_9, window_bounds = array<i64: 1, 6, 32>}, {transform_indices = @transform_10, window_bounds = array<i64: 1, 8, 32>}]} {
    %c0_i32 = arith.constant 0 : i32
    %0 = arith.cmpi eq, %arg1, %c0_i32 : i32
    %1 = arith.extui %0 : i1 to i32
    %c0_i32_0 = arith.constant 0 : i32
    %2 = arith.cmpi ne, %1, %c0_i32_0 : i32
    scf.if %2 {
      %c0_52 = arith.constant 0 : index
      %c0_53 = arith.constant 0 : index
      %c0_54 = arith.constant 0 : index
      %140 = vector.load %arg2[%c0_52, %c0_53, %c0_54] : memref<1x8x64xf32, #tpu.memory_space<vmem>>, vector<1x8x64xf32>
      %141 = vector.shape_cast %140 : vector<1x8x64xf32> to vector<8x64xf32>
      %142 = arith.truncf %141 : vector<8x64xf32> to vector<8x64xbf16>
      %c0_55 = arith.constant 0 : index
      %c0_56 = arith.constant 0 : index
      %143 = vector.load %arg5[%c0_55, %c0_56] : memref<64x32xbf16, #tpu.memory_space<vmem>>, vector<64x32xbf16>
      %cst_57 = arith.constant dense<0.000000e+00> : vector<8x32xf32>
      %144 = tpu.matmul %142, %143, %cst_57 {dimension_numbers = #tpu.dot_dimension_numbers<[1], [0], [0], [1], [0, 0, 1, 1], [], []>} : vector<8x64xbf16>, vector<64x32xbf16>, vector<8x32xf32> -> vector<8x32xf32>
      %c0_58 = arith.constant 0 : index
      %c0_59 = arith.constant 0 : index
      %145 = vector.load %arg6[%c0_58, %c0_59] : memref<1x32xf32, #tpu.memory_space<vmem>>, vector<1x32xf32>
      %146 = vector.broadcast %145 : vector<1x32xf32> to vector<8x32xf32>
      %147 = arith.addf %144, %146 : vector<8x32xf32>
      %c0_60 = arith.constant 0 : index
      %c0_61 = arith.constant 0 : index
      %c0_62 = arith.constant 0 : index
      %148 = vector.load %arg12[%c0_60, %c0_61, %c0_62] : memref<1x8x32xf32, #tpu.memory_space<vmem>>, vector<1x8x32xf32>
      %149 = vector.shape_cast %148 : vector<1x8x32xf32> to vector<8x32xf32>
      %150 = vector.shape_cast %147 : vector<8x32xf32> to vector<1x8x32xf32>
      tpu.vector_store %arg12[%c0_60, %c0_61, %c0_62], %150 {strides = array<i32>} : memref<1x8x32xf32, #tpu.memory_space<vmem>>, vector<1x8x32xf32>,
    } else {
    }
    %c0 = arith.constant 0 : index
    %c0_1 = arith.constant 0 : index
    %c0_2 = arith.constant 0 : index
    %3 = vector.load %arg12[%c0, %c0_1, %c0_2] : memref<1x8x32xf32, #tpu.memory_space<vmem>>, vector<1x8x32xf32>
    %4 = vector.shape_cast %3 : vector<1x8x32xf32> to vector<8x32xf32>
    %c0_3 = arith.constant 0 : index
    %c0_4 = arith.constant 0 : index
    %c0_5 = arith.constant 0 : index
    %5 = vector.load %arg11[%c0_3, %c0_4, %c0_5] : memref<1x6x32xf32, #tpu.memory_space<vmem>>, vector<1x6x32xf32>
    %6 = vector.shape_cast %5 : vector<1x6x32xf32> to vector<6x32xf32>
    %7 = vector.extract_strided_slice %6 {offsets = [0, 0], sizes = [1, 32], strides = [1, 1]} : vector<6x32xf32> to vector<1x32xf32>
    %8 = vector.extract_strided_slice %6 {offsets = [1, 0], sizes = [1, 32], strides = [1, 1]} : vector<6x32xf32> to vector<1x32xf32>
    %9 = vector.extract_strided_slice %6 {offsets = [2, 0], sizes = [1, 32], strides = [1, 1]} : vector<6x32xf32> to vector<1x32xf32>
    %10 = vector.extract_strided_slice %6 {offsets = [3, 0], sizes = [1, 32], strides = [1, 1]} : vector<6x32xf32> to vector<1x32xf32>
    %11 = vector.extract_strided_slice %6 {offsets = [4, 0], sizes = [1, 32], strides = [1, 1]} : vector<6x32xf32> to vector<1x32xf32>
    %12 = vector.extract_strided_slice %6 {offsets = [5, 0], sizes = [1, 32], strides = [1, 1]} : vector<6x32xf32> to vector<1x32xf32>
    %c0_6 = arith.constant 0 : index
    %c0_7 = arith.constant 0 : index
    %c0_8 = arith.constant 0 : index
    %13 = vector.load %arg3[%c0_6, %c0_7, %c0_8] : memref<1x1x32xf32, #tpu.memory_space<vmem>>, vector<1x1x32xf32>
    %14 = vector.shape_cast %13 : vector<1x1x32xf32> to vector<1x32xf32>
    %15 = arith.negf %14 : vector<1x32xf32>
    %16 = math.exp %15 : vector<1x32xf32>
    %cst = arith.constant 1.000000e+00 : f32
    %17 = vector.broadcast %cst : f32 to vector<1x32xf32>
    %18 = arith.addf %17, %16 : vector<1x32xf32>
    %19 = arith.divf %17, %18 : vector<1x32xf32>
    %20 = arith.mulf %14, %19 : vector<1x32xf32>
    %21 = arith.truncf %20 : vector<1x32xf32> to vector<1x32xbf16>
    %c0_9 = arith.constant 0 : index
    %c0_10 = arith.constant 0 : index
    %c0_11 = arith.constant 0 : index
    %22 = vector.load %arg7[%c0_9, %c0_10, %c0_11] : memref<1x32x32xbf16, #tpu.memory_space<vmem>>, vector<1x32x32xbf16>
    %23 = vector.shape_cast %22 : vector<1x32x32xbf16> to vector<32x32xbf16>
    %cst_12 = arith.constant dense<0.000000e+00> : vector<1x32xf32>
    %24 = tpu.matmul %21, %23, %cst_12 {dimension_numbers = #tpu.dot_dimension_numbers<[1], [0], [0], [1], [0, 0, 1, 1], [], []>} : vector<1x32xbf16>, vector<32x32xbf16>, vector<1x32xf32> -> vector<1x32xf32>
    %25 = arith.addf %24, %7 : vector<1x32xf32>
    %c0_13 = arith.constant 0 : index
    %c0_14 = arith.constant 0 : index
    %c0_15 = arith.constant 0 : index
    %26 = vector.load %arg4[%c0_13, %c0_14, %c0_15] : memref<1x8x32xf32, #tpu.memory_space<vmem>>, vector<1x8x32xf32>
    %27 = vector.shape_cast %26 : vector<1x8x32xf32> to vector<8x32xf32>
    %cst_16 = arith.constant dense<0.000000e+00> : vector<8xf32>
    %28 = vector.multi_reduction <add>, %27, %cst_16 [1] : vector<8x32xf32> to vector<8xf32>
    %29 = vector.shape_cast %28 : vector<8xf32> to vector<8x1xf32>
    %cst_17 = arith.constant 3.200000e+01 : f32
    %30 = vector.broadcast %cst_17 : f32 to vector<8x1xf32>
    %31 = arith.divf %29, %30 : vector<8x1xf32>
    %32 = vector.broadcast %31 : vector<8x1xf32> to vector<8x32xf32>
    %33 = arith.subf %27, %32 : vector<8x32xf32>
    %34 = arith.mulf %33, %33 : vector<8x32xf32>
    %cst_18 = arith.constant dense<0.000000e+00> : vector<8xf32>
    %35 = vector.multi_reduction <add>, %34, %cst_18 [1] : vector<8x32xf32> to vector<8xf32>
    %36 = vector.shape_cast %35 : vector<8xf32> to vector<8x1xf32>
    %cst_19 = arith.constant 3.100000e+01 : f32
    %37 = vector.broadcast %cst_19 : f32 to vector<8x1xf32>
    %38 = arith.divf %36, %37 : vector<8x1xf32>
    %cst_20 = arith.constant 9.99999974E-6 : f32
    %39 = vector.broadcast %cst_20 : f32 to vector<8x1xf32>
    %40 = arith.addf %38, %39 : vector<8x1xf32>
    %cst_21 = arith.constant dense<0.000000e+00> : vector<8xf32>
    %41 = vector.multi_reduction <add>, %4, %cst_21 [1] : vector<8x32xf32> to vector<8xf32>
    %42 = vector.shape_cast %41 : vector<8xf32> to vector<8x1xf32>
    %cst_22 = arith.constant 3.200000e+01 : f32
    %43 = vector.broadcast %cst_22 : f32 to vector<8x1xf32>
    %44 = arith.divf %42, %43 : vector<8x1xf32>
    %45 = vector.broadcast %44 : vector<8x1xf32> to vector<8x32xf32>
    %46 = arith.subf %4, %45 : vector<8x32xf32>
    %47 = arith.mulf %46, %46 : vector<8x32xf32>
    %cst_23 = arith.constant dense<0.000000e+00> : vector<8xf32>
    %48 = vector.multi_reduction <add>, %47, %cst_23 [1] : vector<8x32xf32> to vector<8xf32>
    %49 = vector.shape_cast %48 : vector<8xf32> to vector<8x1xf32>
    %cst_24 = arith.constant 3.100000e+01 : f32
    %50 = vector.broadcast %cst_24 : f32 to vector<8x1xf32>
    %51 = arith.divf %49, %50 : vector<8x1xf32>
    %cst_25 = arith.constant 9.99999974E-6 : f32
    %52 = vector.broadcast %cst_25 : f32 to vector<8x1xf32>
    %53 = arith.addf %51, %52 : vector<8x1xf32>
    %54 = math.rsqrt %53 : vector<8x1xf32>
    %55 = math.sqrt %40 : vector<8x1xf32>
    %56 = arith.mulf %54, %55 : vector<8x1xf32>
    %57 = vector.broadcast %44 : vector<8x1xf32> to vector<8x32xf32>
    %58 = arith.subf %4, %57 : vector<8x32xf32>
    %59 = vector.broadcast %56 : vector<8x1xf32> to vector<8x32xf32>
    %60 = arith.mulf %58, %59 : vector<8x32xf32>
    %61 = vector.broadcast %31 : vector<8x1xf32> to vector<8x32xf32>
    %62 = arith.addf %60, %61 : vector<8x32xf32>
    %63 = vector.broadcast %25 : vector<1x32xf32> to vector<8x32xf32>
    %64 = arith.addf %62, %63 : vector<8x32xf32>
    %cst_26 = arith.constant dense<0.000000e+00> : vector<8xf32>
    %65 = vector.multi_reduction <add>, %64, %cst_26 [1] : vector<8x32xf32> to vector<8xf32>
    %66 = vector.shape_cast %65 : vector<8xf32> to vector<8x1xf32>
    %cst_27 = arith.constant 3.200000e+01 : f32
    %67 = vector.broadcast %cst_27 : f32 to vector<8x1xf32>
    %68 = arith.divf %66, %67 : vector<8x1xf32>
    %69 = vector.broadcast %68 : vector<8x1xf32> to vector<8x32xf32>
    %70 = arith.subf %64, %69 : vector<8x32xf32>
    %71 = arith.mulf %70, %70 : vector<8x32xf32>
    %cst_28 = arith.constant dense<0.000000e+00> : vector<8xf32>
    %72 = vector.multi_reduction <add>, %71, %cst_28 [1] : vector<8x32xf32> to vector<8xf32>
    %73 = vector.shape_cast %72 : vector<8xf32> to vector<8x1xf32>
    %cst_29 = arith.constant 3.200000e+01 : f32
    %74 = vector.broadcast %cst_29 : f32 to vector<8x1xf32>
    %75 = arith.divf %73, %74 : vector<8x1xf32>
    %76 = vector.broadcast %68 : vector<8x1xf32> to vector<8x32xf32>
    %77 = arith.subf %64, %76 : vector<8x32xf32>
    %cst_30 = arith.constant 9.99999974E-6 : f32
    %78 = vector.broadcast %cst_30 : f32 to vector<8x1xf32>
    %79 = arith.addf %75, %78 : vector<8x1xf32>
    %80 = math.rsqrt %79 : vector<8x1xf32>
    %81 = vector.broadcast %80 : vector<8x1xf32> to vector<8x32xf32>
    %82 = arith.mulf %77, %81 : vector<8x32xf32>
    %83 = vector.broadcast %9 : vector<1x32xf32> to vector<8x32xf32>
    %84 = arith.mulf %82, %83 : vector<8x32xf32>
    %85 = vector.broadcast %10 : vector<1x32xf32> to vector<8x32xf32>
    %86 = arith.addf %84, %85 : vector<8x32xf32>
    %c0_31 = arith.constant 0 : index
    %c0_32 = arith.constant 0 : index
    %c0_33 = arith.constant 0 : index
    %87 = vector.load %arg8[%c0_31, %c0_32, %c0_33] : memref<1x8x8xbf16, #tpu.memory_space<vmem>>, vector<1x8x8xbf16>
    %88 = vector.shape_cast %87 : vector<1x8x8xbf16> to vector<8x8xbf16>
    %89 = arith.truncf %86 : vector<8x32xf32> to vector<8x32xbf16>
    %cst_34 = arith.constant dense<0.000000e+00> : vector<8x32xf32>
    %90 = tpu.matmul %88, %89, %cst_34 {dimension_numbers = #tpu.dot_dimension_numbers<[1], [0], [0], [1], [0, 0, 1, 1], [], []>} : vector<8x8xbf16>, vector<8x32xbf16>, vector<8x32xf32> -> vector<8x32xf32>
    %c0_35 = arith.constant 0 : index
    %c0_36 = arith.constant 0 : index
    %c0_37 = arith.constant 0 : index
    %91 = vector.load %arg9[%c0_35, %c0_36, %c0_37] : memref<1x8x1xf32, #tpu.memory_space<vmem>>, vector<1x8x1xf32>
    %92 = vector.shape_cast %91 : vector<1x8x1xf32> to vector<8x1xf32>
    %93 = vector.broadcast %92 : vector<8x1xf32> to vector<8x32xf32>
    %94 = arith.addf %90, %93 : vector<8x32xf32>
    %95 = arith.negf %94 : vector<8x32xf32>
    %96 = math.exp %95 : vector<8x32xf32>
    %cst_38 = arith.constant 1.000000e+00 : f32
    %97 = vector.broadcast %cst_38 : f32 to vector<8x32xf32>
    %98 = arith.addf %97, %96 : vector<8x32xf32>
    %99 = arith.divf %97, %98 : vector<8x32xf32>
    %100 = arith.mulf %94, %99 : vector<8x32xf32>
    %101 = arith.addf %64, %100 : vector<8x32xf32>
    %cst_39 = arith.constant dense<0.000000e+00> : vector<8xf32>
    %102 = vector.multi_reduction <add>, %101, %cst_39 [1] : vector<8x32xf32> to vector<8xf32>
    %103 = vector.shape_cast %102 : vector<8xf32> to vector<8x1xf32>
    %cst_40 = arith.constant 3.200000e+01 : f32
    %104 = vector.broadcast %cst_40 : f32 to vector<8x1xf32>
    %105 = arith.divf %103, %104 : vector<8x1xf32>
    %106 = vector.broadcast %105 : vector<8x1xf32> to vector<8x32xf32>
    %107 = arith.subf %101, %106 : vector<8x32xf32>
    %108 = arith.mulf %107, %107 : vector<8x32xf32>
    %cst_41 = arith.constant dense<0.000000e+00> : vector<8xf32>
    %109 = vector.multi_reduction <add>, %108, %cst_41 [1] : vector<8x32xf32> to vector<8xf32>
    %110 = vector.shape_cast %109 : vector<8xf32> to vector<8x1xf32>
    %cst_42 = arith.constant 3.200000e+01 : f32
    %111 = vector.broadcast %cst_42 : f32 to vector<8x1xf32>
    %112 = arith.divf %110, %111 : vector<8x1xf32>
    %113 = vector.broadcast %105 : vector<8x1xf32> to vector<8x32xf32>
    %114 = arith.subf %101, %113 : vector<8x32xf32>
    %cst_43 = arith.constant 9.99999974E-6 : f32
    %115 = vector.broadcast %cst_43 : f32 to vector<8x1xf32>
    %116 = arith.addf %112, %115 : vector<8x1xf32>
    %117 = math.rsqrt %116 : vector<8x1xf32>
    %118 = vector.broadcast %117 : vector<8x1xf32> to vector<8x32xf32>
    %119 = arith.mulf %114, %118 : vector<8x32xf32>
    %120 = vector.broadcast %11 : vector<1x32xf32> to vector<8x32xf32>
    %121 = arith.mulf %119, %120 : vector<8x32xf32>
    %122 = vector.broadcast %12 : vector<1x32xf32> to vector<8x32xf32>
    %123 = arith.addf %121, %122 : vector<8x32xf32>
    %124 = arith.truncf %123 : vector<8x32xf32> to vector<8x32xbf16>
    %c0_44 = arith.constant 0 : index
    %c0_45 = arith.constant 0 : index
    %c0_46 = arith.constant 0 : index
    %125 = vector.load %arg10[%c0_44, %c0_45, %c0_46] : memref<1x32x32xbf16, #tpu.memory_space<vmem>>, vector<1x32x32xbf16>
    %126 = vector.shape_cast %125 : vector<1x32x32xbf16> to vector<32x32xbf16>
    %cst_47 = arith.constant dense<0.000000e+00> : vector<8x32xf32>
    %127 = tpu.matmul %124, %126, %cst_47 {dimension_numbers = #tpu.dot_dimension_numbers<[1], [0], [0], [1], [0, 0, 1, 1], [], []>} : vector<8x32xbf16>, vector<32x32xbf16>, vector<8x32xf32> -> vector<8x32xf32>
    %128 = vector.broadcast %8 : vector<1x32xf32> to vector<8x32xf32>
    %129 = arith.addf %127, %128 : vector<8x32xf32>
    %130 = arith.negf %129 : vector<8x32xf32>
    %131 = math.exp %130 : vector<8x32xf32>
    %cst_48 = arith.constant 1.000000e+00 : f32
    %132 = vector.broadcast %cst_48 : f32 to vector<8x32xf32>
    %133 = arith.addf %132, %131 : vector<8x32xf32>
    %134 = arith.divf %132, %133 : vector<8x32xf32>
    %135 = arith.mulf %129, %134 : vector<8x32xf32>
    %136 = arith.addf %101, %135 : vector<8x32xf32>
    %c0_49 = arith.constant 0 : index
    %c0_50 = arith.constant 0 : index
    %c0_51 = arith.constant 0 : index
    %137 = vector.load %arg12[%c0_49, %c0_50, %c0_51] : memref<1x8x32xf32, #tpu.memory_space<vmem>>, vector<1x8x32xf32>
    %138 = vector.shape_cast %137 : vector<1x8x32xf32> to vector<8x32xf32>
    %139 = vector.shape_cast %136 : vector<8x32xf32> to vector<1x8x32xf32>
    tpu.vector_store %arg12[%c0_49, %c0_50, %c0_51], %139 {strides = array<i32>} : memref<1x8x32xf32, #tpu.memory_space<vmem>>, vector<1x8x32xf32>,
    return
  }
  func.func @transform_0(%arg0: i32, %arg1: i32) -> (i32, i32, i32) {
    %c0_i32 = arith.constant 0 : i32
    %c0_i32_0 = arith.constant 0 : i32
    %c0_i32_1 = arith.constant 0 : i32
    return %arg0, %c0_i32, %c0_i32_0 : i32, i32, i32
  }
  func.func @transform_1(%arg0: i32, %arg1: i32) -> (i32, i32, i32) {
    %c0_i32 = arith.constant 0 : i32
    %c0_i32_0 = arith.constant 0 : i32
    %c0_i32_1 = arith.constant 0 : i32
    return %arg0, %c0_i32, %c0_i32_0 : i32, i32, i32
  }
  func.func @transform_2(%arg0: i32, %arg1: i32) -> (i32, i32, i32) {
    %c0_i32 = arith.constant 0 : i32
    %c0_i32_0 = arith.constant 0 : i32
    %c0_i32_1 = arith.constant 0 : i32
    return %arg0, %c0_i32, %c0_i32_0 : i32, i32, i32
  }
  func.func @transform_3(%arg0: i32, %arg1: i32) -> (i32, i32) {
    %c0_i32 = arith.constant 0 : i32
    %c0_i32_0 = arith.constant 0 : i32
    %c0_i32_1 = arith.constant 0 : i32
    return %c0_i32, %c0_i32_0 : i32, i32
  }
  func.func @transform_4(%arg0: i32, %arg1: i32) -> (i32, i32) {
    %c0_i32 = arith.constant 0 : i32
    %c0_i32_0 = arith.constant 0 : i32
    %c0_i32_1 = arith.constant 0 : i32
    return %c0_i32, %c0_i32_0 : i32, i32
  }
  func.func @transform_5(%arg0: i32, %arg1: i32) -> (i32, i32, i32) {
    %c0_i32 = arith.constant 0 : i32
    %c0_i32_0 = arith.constant 0 : i32
    %c0_i32_1 = arith.constant 0 : i32
    return %arg1, %c0_i32, %c0_i32_0 : i32, i32, i32
  }
  func.func @transform_6(%arg0: i32, %arg1: i32) -> (i32, i32, i32) {
    %c0_i32 = arith.constant 0 : i32
    %c0_i32_0 = arith.constant 0 : i32
    %c0_i32_1 = arith.constant 0 : i32
    return %arg1, %c0_i32, %c0_i32_0 : i32, i32, i32
  }
  func.func @transform_7(%arg0: i32, %arg1: i32) -> (i32, i32, i32) {
    %c0_i32 = arith.constant 0 : i32
    %c0_i32_0 = arith.constant 0 : i32
    %c0_i32_1 = arith.constant 0 : i32
    return %arg1, %c0_i32, %c0_i32_0 : i32, i32, i32
  }
  func.func @transform_8(%arg0: i32, %arg1: i32) -> (i32, i32, i32) {
    %c0_i32 = arith.constant 0 : i32
    %c0_i32_0 = arith.constant 0 : i32
    %c0_i32_1 = arith.constant 0 : i32
    return %arg1, %c0_i32, %c0_i32_0 : i32, i32, i32
  }
  func.func @transform_9(%arg0: i32, %arg1: i32) -> (i32, i32, i32) {
    %c0_i32 = arith.constant 0 : i32
    %c0_i32_0 = arith.constant 0 : i32
    %c0_i32_1 = arith.constant 0 : i32
    return %arg1, %c0_i32, %c0_i32_0 : i32, i32, i32
  }
  func.func @transform_10(%arg0: i32, %arg1: i32) -> (i32, i32, i32) {
    %c0_i32 = arith.constant 0 : i32
    %c0_i32_0 = arith.constant 0 : i32
    %c0_i32_1 = arith.constant 0 : i32
    return %arg0, %c0_i32, %c0_i32_0 : i32, i32, i32
  }
}

</mosaic_0001>

<bundles_post_ra>
// kernel: tpu_custom_call.1
= control target key start
LH: loop header
LB: loop body
LE: loop exit
PB: predicated region body
PF: predicated region fallthrough
CT: control target
= control target key end

     0   :  { %s2013_s0 = inlined_call_operand.hbm [shape: f32[2,8,64], index: 0, kind: input, shape index: {}]   ;;  %s2014_s1 = inlined_call_operand.vmem [shape: f32[2,1,32], index: 1, kind: input, shape index: {}]   ;;  %s2015_s2 = inlined_call_operand.hbm [shape: f32[2,8,32], index: 2, kind: input, shape index: {}]   ;;  %s2016_s3 = inlined_call_operand.vmem [shape: bf16[64,32], index: 3, kind: input, shape index: {}]   ;;  %s2017_s4 = inlined_call_operand.vmem [shape: f32[1,32], index: 4, kind: input, shape index: {}]   ;;  %s2018_s5 = inlined_call_operand.vmem [shape: bf16[3,32,32], index: 5, kind: input, shape index: {}]   ;;  %s2019_s6 = inlined_call_operand.hbm [shape: bf16[3,8,8], index: 6, kind: input, shape index: {}]   ;;  %s2020_s7 = inlined_call_operand.vmem [shape: f32[3,8,1], index: 7, kind: input, shape index: {}]   ;;  %s2021_s8 = inlined_call_operand.hbm [shape: bf16[3,32,32], index: 8, kind: input, shape index: {}]   ;;  %s2022_s9 = inlined_call_operand.vmem [shape: f32[3,6,32], index: 9, kind: input, shape index: {}]   ;;  %s2023_s10 = inlined_call_operand.hbm [shape: f32[2,8,32], index: 10, kind: output, shape index: {}]  }
   0x1   :  { %2037 = sst [smem:[#allocation26_spill]] %s2013_s0 }
   0x2   :  { %2038 = sst [smem:[#allocation27_spill]] %s2014_s1 }
   0x3   :  { %2039 = sst [smem:[#allocation28_spill]] %s2015_s2 }
   0x4   :  { %2040 = sst [smem:[#allocation29_spill]] %s2016_s3 }
   0x5   :  { %2041 = sst [smem:[#allocation30_spill]] %s2017_s4 }
   0x6   :  { %2042 = sst [smem:[#allocation31_spill]] %s2018_s5 }
   0x7   :  { %2043 = sst [smem:[#allocation32_spill]] %s2019_s6 }
   0x8   :  { %2044 = sst [smem:[#allocation33_spill]] %s2020_s7 }
   0x9   :  { %2045 = sst [smem:[#allocation34_spill]] %s2021_s8 }
   0xa   :  { %2046 = sst [smem:[#allocation35_spill]] %s2022_s9 }
   0xb   :  { %2047 = sst [smem:[#allocation36_spill]] %s2023_s10 }
   0xc   :  { %15 = vsyncpa [#allocation3], 0 }
   0xd   :  { %17 = vsyncpa [#allocation3 + $0x1], 0 }
   0xe   :  { %18 = vsyncpa [#allocation6], 0 }
   0xf   :  { %20 = vsyncpa [#allocation6 + $0x1], 0 }
  0x10   :  { %21 = vsyncpa [#allocation9], 0 }
  0x11   :  { %23 = vsyncpa [#allocation9 + $0x1], 0 }
  0x12   :  { %24 = vsyncpa [#allocation4], 0 }
  0x13   :  { %26 = vsyncpa [#allocation4 + $0x1], 0  ;;  %s1664_s13 = smov 0   ;;  %s1666_s14 = smov 0  }
  0x14   :  { %s1668_s15 = smov 0   ;;  %s1670_s16 = smov 0  }
  0x15   :  { %s1672_s17 = smov 0   ;;  %s1674_s18 = smov 0  }
  0x16   :  { %s1676_s19 = smov 0   ;;  %s1678_s20 = smov 0  }
  0x17   :  { %s1680_s21 = smov 0   ;;  %s1682_s22 = smov 0  }
  0x18   :  { %s1684_s23 = smov 0  }
  0x19 LB: > { %2048 = sst [smem:[#allocation16_spill]] %s1574_s16  ;;  %s1718_s24 = sadd.s32 4294967295, %s1602_s23   ;;  %s1602_s23 = sphi %s1684_s23, %s32_s23   ;;  %s1598_s22 = sphi %s1682_s22, %s2094_s22   ;;  %s1594_s21 = sphi %s1680_s21, %s2093_s21   ;;  %s1590_s20 = sphi %s1678_s20, %s2092_s20   ;;  %s1586_s19 = sphi %s1676_s19, %s2091_s19   ;;  %s1582_s18 = sphi %s1674_s18, %s2090_s18   ;;  %s1578_s17 = sphi %s1672_s17, %s2099_s17   ;;  %s1574_s16 = sphi %s1670_s16, %s2098_s16   ;;  %s1570_s15 = sphi %s1668_s15, %s2097_s15   ;;  %s1566_s14 = sphi %s1666_s14, %s2096_s14   ;;  %s1562_s13 = sphi %s1664_s13, %s2095_s13  }
  0x1a   : > { %2049 = sst [smem:[#allocation17_spill]] %s1582_s18  ;;  %s1124_s25 = sadd.s32 4294967294, %s1602_s23  }
  0x1b   : > { %2050 = sst [smem:[#allocation18_spill]] %s1594_s21  ;;  %p58_p0 = scmp.ne.s32.totalorder %s1582_s18, %s1578_s17 }
  0x1c   : > { %2051 = sst [smem:[#allocation19_spill]] %s1598_s22  ;;  %p59_p1 = scmp.eq.s32.totalorder %s1602_s23, 0 }
  0x1d   : > { %2052 = sst [smem:[#allocation20_spill]] %s1602_s23  ;;  %p64_p2 = scmp.ne.s32.totalorder %s1578_s17, %s1574_s16 }
  0x1e   : > { %p65_p3 = scmp.eq.s32.totalorder %s1718_s24, 0  ;;  %p1729_p4 = por %p59_p1, %p58_p0 }
  0x1f   : > { %p204_p5 = scmp.ne.s32.totalorder %s1570_s15, %s1566_s14  ;;  %p210_p7 = scmp.ne.s32.totalorder %s1566_s14, %s1562_s13 }
  0x20   : > { %p1735_p6 = por %p65_p3, %p64_p2  ;;  %p312_p9 = scmp.eq.s32.totalorder %s1718_s24, 5 }
  0x21   : > { %p1740_p8 = por %p204_p5, %p59_p1  ;;  %p1745_p10 = por %p210_p7, %p65_p3 }
  0x22   : > { %p318_p11 = scmp.eq.s32.totalorder %s1124_s25, 5  ;;  %p1749_p12 = por %p312_p9, %p58_p0 }
  0x23   : > { %p1227_p1 = scmp.lt.s32.totalorder %s1602_s23, 6  ;;  %s344_s13 = sand.u32 1, %s1582_s18  }
  0x24   : > { %s2057_s12 = scalar_select %p1749_p12, 1, 0 }
  0x25   : > { %p1753_p13 = por %p318_p11, %p64_p2  ;;  %s1128_s26 = sshll.u32 %s1598_s22, 3 }
  0x26   : > { %2058 = sst [smem:[#allocation21_spill]] %s2057_s12  ;;  %s1127_s16 = sshll.u32 %s344_s13, 3 }
  0x27   : > { %s2059_s27 = scalar_select %p1753_p13, 1, 0 }
  0x28   : > { %p1762_p3 = pnand %p1227_p1, %p1729_p4  ;;  %s369_s25 = sand.u32 1, %s1602_s23  }
  0x29   : > { %2060 = sst [smem:[#allocation22_spill]] %s2059_s27  ;;  %s373_s9 = scalar_lea.vmem [#allocation5], %s1127_s16 }
  0x2a   : > { %s2062_s2 = sld [smem:[#allocation28_spill]]  ;;  %s381_s7 = sshll.u32 %s373_s9, 4  ;;  %s382_s7 = int_to_ptr.vmem [resolvable:$true] %s381_s7 }
  0x2b   : > { %p1772_p0 = pnand %p1227_p1, %p1740_p8  ;;  %s1776_s5 = scalar_lea.sflag [#allocation6], %s369_s25 }
  0x2c   : > { %p1136_p2 = scmp.ge.s32.totalorder %s1602_s23, 1  ;;  %p449_p4 = scmp.lt.s32.totalorder %s1602_s23, 7 }
  0x2d   : > { %s2065_s0 = sld [smem:[#allocation26_spill]]  ;;  %s41_s23 = sadd.s32 1, %s1594_s21 }
  0x2e   : > { %p1783_p5 = pnand %p1136_p2, %p449_p4  ;;  %s1795_s1 = sand.u32 1, %s1570_s15  }
  0x2f   : > { %p42_p7 = scmp.ge.s32.totalorder %s41_s23, 3  ;;  %s1131_s4 = sshll.u32 %s1795_s1, 2 }
  0x30   : > { %s377_s12 = scalar_lea.hbm %s2062_s2, %s1128_s26  ;;  %s1132_s9 = sshll.u32 %s1594_s21, 2 }
  0x31   : > { %s379_s27 = sshll.u32 %s377_s12, 4  ;;  %s348_s12 = scalar_lea.vmem [#allocation2], %s1127_s16  ;;  %s380_s27 = int_to_ptr.hbm [resolvable:$true] %s379_s27 }
  0x32   : > { %1216 = dma.hbm_to_vmem [thread:$0]  (!%p1762_p3), %s380_s27, 128, %s382_s7, %s1776_s5  }
  0x33   : > { %s352_s30 = scalar_lea.hbm %s2065_s0, %s1128_s26  ;;  %s356_s25 = sshll.u32 %s348_s12, 4  ;;  %s357_s25 = int_to_ptr.vmem [resolvable:$true] %s356_s25 }
  0x34   : > { %s354_s2 = sshll.u32 %s352_s30, 4  ;;  %s345_s7 = scalar_lea.sflag [#allocation3], %s344_s13  ;;  %s355_s2 = int_to_ptr.hbm [resolvable:$true] %s354_s2 }
  0x35   : > { %1213 = dma.hbm_to_vmem [thread:$0]  (!%p1762_p3), %s355_s2, 128, %s357_s25, %s345_s7  }
  0x36   : > { %s197_s27 = sadd.s32 1, %s1570_s15  ;;  %s2101_s23 = smov (%p42_p7, %s41_s23), 0 }
  0x37   : > { %2066 = sst [smem:[#allocation23_spill]] %s2101_s23  ;;  %s2067_s16 = sadd.s32 1, %s1598_s22 }
  0x38   : > { %s2103_s16 = smov (!%p42_p7, %s2067_s16), %s1598_s22  ;;  %s194_s2 = ssub.s32 %s1594_s21, %s2101_s23 }
  0x39   : > { %s2068_s6 = sld [smem:[#allocation32_spill]]  ;;  %p46_p8 = scmp.ge.s32.totalorder %s2103_s16, 2 }
  0x3a   : > { %p195_p9 = scmp.eq.s32.totalorder %s194_s2, 0  ;;  %s400_s12 = scalar_lea.vmem [#allocation7], %s1131_s4 }
  0x3b   : > { %s408_s25 = sshll.u32 %s400_s12, 4  ;;  %s2105_s16 = smov (%p46_p8, %s2103_s16), 0  ;;  %s409_s25 = int_to_ptr.vmem [resolvable:$true] %s408_s25 }
  0x3c   : > { %2069 = sst [smem:[#allocation24_spill]] %s2105_s16  ;;  %s48_s0 = ssub.s32 %s1598_s22, %s2105_s16 }
  0x3d   : > { %s1812_s7 = scalar_select %p195_p9, %s1570_s15, %s197_s27  }
  0x3e   : > { %p49_p11 = scmp.eq.s32.totalorder %s48_s0, 0  ;;  %s2070_s10 = sadd.s32 1, %s1582_s18 }
  0x3f   : > { %s404_s13 = scalar_lea.hbm %s2068_s6, %s1132_s9  ;;  %s1133_s2 = sshll.u32 %s1795_s1, 4 }
  0x40   : > { %s406_s30 = sshll.u32 %s404_s13, 4  ;;  %s1190_s26 = sshll.u32 %s1594_s21, 4  ;;  %s407_s30 = int_to_ptr.hbm [resolvable:$true] %s406_s30 }
  0x41   : > { %1219 = dma.hbm_to_vmem [thread:$0]  (!%p1772_p0), %s407_s30, 64, %s409_s25, %s1776_s5  }
  0x42   : > { %s1822_s9 = scalar_select %p49_p11, %s1582_s18, %s2070_s10  }
  0x43   : > { %s2072_s8 = sld [smem:[#allocation34_spill]]  ;;  %s426_s6 = scalar_lea.vmem [#allocation8], %s1133_s2 }
  0x44   : > { %2071 = sst [smem:[#allocation25_spill]] %s1822_s9  ;;  %s434_s23 = sshll.u32 %s426_s6, 4  ;;  %s435_s23 = int_to_ptr.vmem [resolvable:$true] %s434_s23 }
  0x45   : > { %s423_s16 = scalar_lea.sflag [#allocation9], %s1795_s1  ;;  %s1604_s22 = smov 64  }
  0x46   : > { %s1605_s0 = smov 4   ;;  %s1835_s5 = sand.u32 (!%p1783_p5), 1, %s1578_s17  }
  0x47   : > { %453 = sbr.rel (%p1783_p5) target bundleno = 1404 (0x57c), region = 60  ;;  %s1838_s30 = sshll.u32 (!%p1783_p5), %s1835_s5, 3 }
  0x48   : > { %s456_s6 = scalar_lea.sflag (!%p1783_p5), [#allocation3], %s1835_s5 }
  0x49   : > { %s431_s12 = scalar_lea.hbm %s2072_s8, %s1190_s26 }
  0x4a   : > { %s432_s27 = sshll.u32 %s431_s12, 4  ;;  %s433_s27 = int_to_ptr.hbm [resolvable:$true] %s432_s27 }
  0x4b   : > { %1222 = dma.hbm_to_vmem [thread:$0]  (!%p1772_p0), %s433_s27, 256, %s435_s23, %s423_s16, %s1604_s22, %s1604_s22, %s1605_s0  }
  0x4c   : > { %1541 = dma.done.wait (%p1735_p6), %s456_s6, 128  }
  0x4d   : > { %1543 = vsyncadd (%p1735_p6), %s456_s6, 4294967168  ;;  %s465_s1 = sand.u32 1, %s1718_s24  }
  0x4e   : > { %s466_s22 = scalar_lea.sflag [#allocation6], %s465_s1 }
  0x4f   : > { %1545 = dma.done.wait (%p1735_p6), %s466_s22, 128  }
  0x50   : > { %1547 = vsyncadd (%p1735_p6), %s466_s22, 4294967168  ;;  %s477_s28 = sand.u32 1, %s1566_s14  }
  0x51   : > { %s1139_s3 = sshll.u32 %s477_s28, 2 }
  0x52   : > { %s1853_s16 = scalar_lea.vmem [#allocation7], %s1139_s3 }
  0x53   : > { %1549 = dma.done.wait (%p1745_p10), %s466_s22, 64  }
  0x54   : > { %1551 = vsyncadd (%p1745_p10), %s466_s22, 4294967232  ;;  %s1140_s24 = sshll.u32 %s477_s28, 4  ;;  %s486_s10 = scalar_lea.sflag [#allocation9], %s477_s28 }
  0x55   : > { %s1859_s2 = scalar_lea.vmem [#allocation8], %s1140_s24 }
  0x56   : > { %1553 = dma.done.wait (%p1745_p10), %s486_s10, 256  }
  0x57   : > { %1555 = vsyncadd (%p1745_p10), %s486_s10, 4294967040  ;;  %p558_p6 = scmp.lt.s32.totalorder %s1590_s20, 1  ;;  %p561_p1 = scmp.lt.s32.totalorder %s1586_s19, 2 }
  0x58   : > { %s2073_s12 = sld [smem:[#allocation27_spill]]  ;;  %s1891_s18 = scalar_lea.vmem [#allocation10], %s1838_s30 }
  0x59   : > { %s1868_s29 = scalar_select %p558_p6, %s1590_s20, 1 }
  0x5a   : > { %s562_s26 = scalar_select %p561_p1, %s1586_s19, 2 }
  0x5b   : > { %s2074_s22 = sld [smem:[#allocation31_spill]]  ;;  %p1146_p10 = scmp.ne.s32.totalorder %s1586_s19, 0 }
  0x5c   : > { %s1191_s0 = sshll.u32 %s562_s26, 4  ;;  %s1144_s6 = sshll.u32 %s562_s26, 3 }
  0x5d   : > { %s2075_s10 = sld [smem:[#allocation33_spill]] }
  0x5e   : > { %s560_s27 = scalar_lea.vmem %s2073_s12, %s1868_s29  ;;  %s2076_s21 = sld [smem:[#allocation35_spill]] }
  0x5f   : > { %s2077_s13 = sld [smem:[#allocation29_spill]] (!%p1146_p10) }
  0x60   : > { %578 = sbr.rel (%p1146_p10) target bundleno = 251 (0xfb), region = 80  ;;  %s2080_s3 = sld [smem:[#allocation30_spill]] (!%p1146_p10) }
  0x61   : > { %s1878_s28 = scalar_lea.vmem %s2074_s22, %s1191_s0 }
  0x63   : > { %s1883_s23 = scalar_lea.vmem %s2075_s10, %s1144_s6 }
  0x64   : > { %s1888_s9 = scalar_lea.vmem %s2076_s21, %s1144_s6  ;;  %s2079_s6 = scalar_lea.vmem (!%p1146_p10), [#allocation2], %s1838_s30 }
  0x65   : > { %s2078_s12 = smov %s2077_s13  ;;  %v1195_v0 = vld [vmem:[%s2077_s13 + $0x18] sm:$0xff]  ;;  %v579_v4 = vld [vmem:[%s2079_s6] sm:$0xff]  ;;  %vm617_vm0 = vcmask 523264   ;;  %vm634_vm1 = vcmask 261120  }
  0x66   : > { %625 = vmatpush.bf16.msra.mxu0 %v1195_v0  ;;  %v1194_v1 = vld [vmem:[%s2078_s12 + $0x10] sm:$0xff]  ;;  %v1193_v2 = vld [vmem:[%s2078_s12 + $0x8] sm:$0xff]  ;;  %v1192_v3 = vld [vmem:[%s2078_s12] sm:$0xff]  ;;  %v580_v5 = vpack.c.bf16 %v579_v4, %v579_v4 }
  0x67   : > { %v1322_v6 = vld [vmem:[%s2080_s3] ss:$0 sm:$0xff] }
  0x6a   : > { %626 = vmatpush.bf16.msra.mxu0 %v1194_v1 }
  0x6e   : > { %627 = vmatpush.bf16.msra.mxu0 %v1193_v2 }
  0x72   : > { %628 = vmatpush.bf16.msra.mxu0 %v1192_v3 }
  0x75   : > { %1163 = vmatmul.msk.bf16.vlgmr.msra.gmra.mxu0 %vm617_vm0, %v580_v5 }
  0xf2   : > { %v630_v7 = vpop.f32.mrf.mxu0 }
  0xf3   : > { %v631_v8 = vadd.f32 %v1322_v6, %v630_v7 }
  0xf5   : > { %635 = vst.msk [vmem:[%s1891_s18] sm:$0xff] %vm634_vm1, %v631_v8 }
  0xfa   : > { %v632_v9 = vpop.f32.mrf.mxu0 }
  0xfb PF: > { %vm676_vm2 = vcmask 261120   ;;  %s2081_s24 = scalar_lea.vmem [#allocation5], %s1838_s30  ;;  %v638_v14 = vld [vmem:[%s560_s27] sm:$0x1]  ;;  %v1606_v18 = vmov 32.0   ;;  %v1197_v23 = vld [vmem:[%s1878_s28 + $0x8] sm:$0xff] }
  0xfc   : > { %v693_v10 = vld [vmem:[%s2081_s24] sm:$0xff]  ;;  %v636_v12 = vld [vmem:[%s1891_s18] sm:$0xff]  ;;  %v1164_v15 = vmul.f32 -1.442695, %v638_v14  ;;  %686 = vmatpush.bf16.msra.mxu0 %v1197_v23  ;;  %v1196_v30 = vld [vmem:[%s1878_s28] sm:$0xff]  ;;  %v1607_v49 = vmov 31.0  }
  0xfd   : > { %v694_v11 = vsel %vm676_vm2, %v693_v10, 0.0  ;;  %v719_v13 = vsel %vm676_vm2, %v636_v12, 0.0  ;;  %vm795_vm1 = vcmask 1043456   ;;  %s928_s28 = sshll.u32 %s1891_s18, 4  ;;  %s929_s28 = int_to_ptr.vmem [resolvable:$true] %s928_s28 }
  0xfe   : > { %695 = vadd.xlane.f32.xlu0 %v694_v11  ;;  %1324 = vpow2.f32 %v1164_v15 }
 0x100   : > { %687 = vmatpush.bf16.msra.mxu0 %v1196_v30 }
 0x104   : > { %v1325_v16 = vpop.eup %1324 }
 0x105   : > { %v642_v17 = vadd.f32 1.0, %v1325_v16 }
 0x106   : > { %720 = vadd.xlane.f32.xlu0 %v719_v13 }
 0x107   : > { %1326 = vrcp.f32 %v642_v17  ;;  %v654_v26 = vand.u32 2147483648, %v642_v17  ;;  %vm648_vm3 = vweird.f32 %v642_v17  ;;  %v652_v28 = vand.u32 2147483647, %v642_v17 }
 0x108   : > { %1328 = vrcp.f32 %v1606_v18 }
 0x109   : > { %v655_v29 = vor.u32 1.1754944e-38, %v654_v26  ;;  %vm653_vm6 = vcmp.eq.f32.partialorder %v652_v28, 8.507059e+37  ;;  %1330 = vrcp.f32 %v1607_v49 }
 0x10d   : > { %v1327_v19 = vpop.eup %1326 }
 0x10e   : > { %v644_v20 = vmul.f32 %v1327_v19, %v642_v17  ;;  %v1329_v21 = vpop.eup %1328  ;;  %vm649_vm4 = vweird.f32 %v1327_v19 }
 0x10f   : > { %v698_v25 = vmul.f32 32.0, %v1329_v21  ;;  %vm650_vm5 = vmor %vm648_vm3, %vm649_vm4  ;;  %vm702_vm7 = vweird.f32 %v1329_v21  ;;  %v1331_v50 = vpop.eup %1330  ;;  %vm791_vm3 = vcmask 64512  }
 0x110   : > { %v645_v22 = vsub.f32 1.0, %v644_v20  ;;  %v711_v51 = vmul.f32 31.0, %v1331_v50  ;;  %vm715_vm8 = vweird.f32 %v1331_v50 }
 0x111   : > { %v699_v33 = vsub.f32 1.0, %v698_v25 }
 0x112   : > { %v646_v24 = vmul.f32 %v1327_v19, %v645_v22  ;;  %v712_v52 = vsub.f32 1.0, %v711_v51 }
 0x113   : > { %v700_v36 = vmul.f32 %v1329_v21, %v699_v33  ;;  %v785_v33 = vld [vmem:[%s1883_s23] sm:$0xff] }
 0x114   : > { %v647_v27 = vadd.f32 %v1327_v19, %v646_v24  ;;  %v713_v53 = vmul.f32 %v1331_v50, %v712_v52 }
 0x115   : > { %v701_v37 = vadd.f32 %v1329_v21, %v700_v36 }
 0x116   : > { %v651_v31 = vsel %vm650_vm5, %v1327_v19, %v647_v27  ;;  %v714_v55 = vadd.f32 %v1331_v50, %v713_v53 }
 0x117   : > { %v656_v32 = vsel %vm653_vm6, %v655_v29, %v651_v31  ;;  %v1925_v38 = vsel %vm702_vm7, %v1329_v21, %v701_v37 }
 0x118   : > { %v658_v34 = vmul.f32 %v656_v32, %v638_v14  ;;  %v716_v56 = vsel %vm715_vm8, %v1331_v50, %v714_v55  ;;  %v783_v50 = vld [vmem:[%s1853_s16] sm:$0xf]  ;;  %s2083_s16 = sld [smem:[#allocation36_spill]] }
 0x11a   : > { %v659_v35 = vpack.c.bf16 %v658_v34, %v658_v34  ;;  %v1608_v34 = vmov 0  }
 0x11b   : > { %1323 = vset.pattern.permute.xlu0 %v1608_v34 }
 0x11c   : > { %1173 = vmatmul.msk.bf16.vlgmr.msra.gmra.mxu0 %vm676_vm2, %v659_v35  ;;  %788 = vperm.xlu0 %1323, %v785_v33  }
 0x171   : > { %v696_v39 = vpop.xlane.xlu0 %695 }
 0x172   : > { %v704_v40 = vmul.f32 %v1925_v38, %v696_v39 }
 0x174   : > { %v705_v41 = vsub.f32 %v693_v10, %v704_v40 }
 0x176   : > { %v706_v42 = vmul.f32 %v705_v41, %v705_v41 }
 0x178   : > { %v707_v43 = vsel %vm676_vm2, %v706_v42, 0.0 }
 0x179   : > { %708 = vadd.xlane.f32.xlu1 %v707_v43  ;;  %v721_v44 = vpop.xlane.xlu0 %720 }
 0x17a   : > { %v722_v45 = vmul.f32 %v721_v44, %v1925_v38 }
 0x17c   : > { %v723_v46 = vsub.f32 %v636_v12, %v722_v45  ;;  %v1932_v12 = vld [vmem:[%s1888_s9] sm:$0x3f]  ;;  %s1187_s9 = sshll.u32 %s1590_s20, 3  ;;  %s916_s20 = scalar_lea.sflag [#allocation4], %s1835_s5 }
 0x17d   : > { %v779_v42 = vperm.slane %v1932_v12, 2  ;;  %v781_v45 = vperm.slane %v1932_v12, 3  ;;  %s926_s29 = scalar_lea.hbm %s2083_s16, %s1187_s9 }
 0x17e   : > { %v724_v47 = vmul.f32 %v723_v46, %v723_v46  ;;  %s930_s13 = sshll.u32 %s926_s29, 4  ;;  %s931_s13 = int_to_ptr.hbm [resolvable:$true] %s930_s13 }
 0x17f   : > { %s1482_s0 = sshra.s32 %s931_s13, 4  ;;  %s1483_s0 = int_to_ptr.hbm [resolvable:$true] %s1482_s0 }
 0x180   : > { %v725_v48 = vsel %vm676_vm2, %v724_v47, 0.0  ;;  %s1484_s1 = scalar_lea.hbm %s1483_s0, 8 }
 0x181   : > { %726 = vadd.xlane.f32.xlu1 %v725_v48  ;;  %p1485_p3 = scmp.ne.s32.totalorder %s1483_s0, %s1484_s1 }
 0x183   : > { %p1486_p0 = pnand %p1485_p3, %p1749_p12 }
 0x185   : > { %p1487_p2 = pneg %p1486_p0 }
 0x18e   : > { %v789_v51 = vpop.permute.xlu0 %788 }
 0x199   : > { %v689_v54 = vpop.f32.mrf.mxu0 }
 0x19a   : > { %v690_v16 = vadd.f32 %v689_v54, %v1932_v12 }
 0x19c   : > { %v755_v21 = vperm.slane %v690_v16, 0 }
 0x1a1   : > { %v691_v58 = vpop.f32.mrf.mxu0 }
 0x1ec   : > { %v709_v57 = vpop.xlane.xlu1 %708 }
 0x1ed   : > { %v717_v59 = vmul.f32 %v716_v56, %v709_v57 }
 0x1ef   : > { %v718_v60 = vadd.f32 1e-05, %v717_v59 }
 0x1f1   : > { %1332 = vrsqrt.f32 %v718_v60  ;;  %vm747_vm10 = vcmp.eq.f32.partialorder %v718_v60, inf  ;;  %v750_v15 = vand.u32 2147483648, %v718_v60  ;;  %vm749_vm13 = vcmp.eq.f32.partialorder %v718_v60, 0.0 }
 0x1f4   : > { %v727_v61 = vpop.xlane.xlu1 %726 }
 0x1f5   : > { %v728_v62 = vmul.f32 %v727_v61, %v716_v56 }
 0x1f7   : > { %v1333_v63 = vpop.eup %1332  ;;  %v729_v0 = vadd.f32 1e-05, %v728_v62 }
 0x1f8   : > { %v741_v1 = vmul.f32 %v1333_v63, %v718_v60 }
 0x1f9   : > { %1334 = vrsqrt.f32 %v729_v0  ;;  %vm736_vm11 = vweird.f32 %v729_v0 }
 0x1fa   : > { %v742_v2 = vmul.f32 %v1333_v63, %v741_v1 }
 0x1fc   : > { %v743_v3 = vmul.f32 0.5, %v742_v2 }
 0x1fe   : > { %v744_v4 = vsub.f32 1.5, %v743_v3 }
 0x1ff   : > { %v1335_v5 = vpop.eup %1334 }
 0x200   : > { %v731_v6 = vmul.f32 %v1335_v5, %v729_v0  ;;  %v745_v7 = vmul.f32 %v1333_v63, %v744_v4  ;;  %vm737_vm9 = vweird.f32 %v1335_v5 }
 0x201   : > { %vm738_vm12 = vmor %vm736_vm11, %vm737_vm9 }
 0x202   : > { %v732_v8 = vmul.f32 %v1335_v5, %v731_v6  ;;  %v746_v9 = vmul.f32 %v745_v7, %v718_v60 }
 0x204   : > { %v733_v10 = vmul.f32 0.5, %v732_v8  ;;  %v748_v13 = vsel %vm747_vm10, %v718_v60, %v746_v9 }
 0x205   : > { %v751_v18 = vsel %vm749_vm13, %v750_v15, %v748_v13  ;;  %v1199_v13 = vld [vmem:[%s1859_s2 + $0x8] sm:$0xff] }
 0x206   : > { %v734_v11 = vsub.f32 1.5, %v733_v10  ;;  %886 = vmatpush.bf16.msra.mxu2 %v1199_v13 }
 0x208   : > { %v735_v14 = vmul.f32 %v1335_v5, %v734_v11 }
 0x20a   : > { %v739_v17 = vsel %vm738_vm12, %v1335_v5, %v735_v14  ;;  %v1198_v14 = vld [vmem:[%s1859_s2] sm:$0xff]  ;;  %s2084_s2 = smov %s2083_s16 }
 0x20b   : > { %v752_v19 = vmul.f32 %v751_v18, %v739_v17  ;;  %887 = vmatpush.bf16.msra.mxu2 %v1198_v14  ;;  %s1488_s25 = scalar_lea.hbm %s2084_s2, 16  ;;  %p1489_p4 = scmp.lt.s32.totalorder %s1483_s0, %s2084_s2 }
 0x20c   : > { %p1490_p5 = scmp.lt.s32.totalorder %s1488_s25, %s1484_s1 }
 0x20d   : > { %v753_v20 = vmul.f32 %v752_v19, %v723_v46 }
 0x20e   : > { %p1491_p7 = por %p1490_p5, %p1489_p4 }
 0x20f   : > { %v754_v22 = vadd.f32 %v753_v20, %v704_v40 }
 0x210   : > { %p1492_p8 = pnand %p1491_p7, %p1487_p2 }
 0x211   : > { %v1935_v23 = vadd.f32 %v755_v21, %v754_v22 }
 0x213   : > { %v757_v24 = vsel %vm676_vm2, %v1935_v23, 0.0 }
 0x214   : > { %758 = vadd.xlane.f32.xlu2 %v757_v24  ;;  %v855_v24 = vperm.slane %v1932_v12, 4 }
 0x287   : > { %v759_v25 = vpop.xlane.xlu2 %758 }
 0x288   : > { %v760_v26 = vmul.f32 %v759_v25, %v1925_v38 }
 0x28a   : > { %v761_v27 = vsub.f32 %v1935_v23, %v760_v26 }
 0x28c   : > { %v762_v28 = vmul.f32 %v761_v27, %v761_v27 }
 0x28e   : > { %v763_v29 = vsel %vm676_vm2, %v762_v28, 0.0 }
 0x28f   : > { %764 = vadd.xlane.f32.xlu2 %v763_v29 }
 0x302   : > { %v765_v30 = vpop.xlane.xlu2 %764 }
 0x303   : > { %v766_v31 = vmul.f32 %v765_v30, %v1925_v38  ;;  %v864_v30 = vperm.slane %v1932_v12, 1 }
 0x305   : > { %v767_v32 = vadd.f32 1e-05, %v766_v31 }
 0x307   : > { %1336 = vrsqrt.f32 %v767_v32  ;;  %vm774_vm15 = vweird.f32 %v767_v32 }
 0x30d   : > { %v1337_v35 = vpop.eup %1336 }
 0x30e   : > { %v769_v36 = vmul.f32 %v1337_v35, %v767_v32  ;;  %vm775_vm14 = vweird.f32 %v1337_v35 }
 0x30f   : > { %vm776_vm0 = vmor %vm774_vm15, %vm775_vm14 }
 0x310   : > { %v770_v37 = vmul.f32 %v1337_v35, %v769_v36 }
 0x312   : > { %v771_v39 = vmul.f32 0.5, %v770_v37 }
 0x314   : > { %v772_v40 = vsub.f32 1.5, %v771_v39 }
 0x316   : > { %v773_v41 = vmul.f32 %v1337_v35, %v772_v40 }
 0x318   : > { %v777_v43 = vsel %vm776_vm0, %v1337_v35, %v773_v41 }
 0x319   : > { %v778_v44 = vmul.f32 %v777_v43, %v761_v27  ;;  %v857_v27 = vperm.slane %v1932_v12, 5 }
 0x31b   : > { %v780_v46 = vmul.f32 %v779_v42, %v778_v44 }
 0x31d   : > { %v782_v47 = vadd.f32 %v781_v45, %v780_v46 }
 0x31f   : > { %v784_v48 = vpack.c.bf16 %v782_v47, %v782_v47 }
 0x321   : > { %v797_v49 = vsel %vm795_vm1, %v784_v48, 0 }
 0x322   : > { %806 = vmatpush.bf16.msra.mxu1 %v797_v49 }
 0x325   : > { %1174 = vmatmul.msk.bf16.vlgmr.msra.gmra.mxu1 %vm791_vm3, %v783_v50 }
 0x3a2   : > { %v808_v52 = vpop.f32.mrf.mxu1 }
 0x3a3   : > { %v809_v53 = vadd.f32 %v808_v52, %v789_v51 }
 0x3a5   : > { %v1175_v54 = vmul.f32 -1.442695, %v809_v53 }
 0x3a7   : > { %1338 = vpow2.f32 %v1175_v54 }
 0x3aa   : > { %v810_v55 = vpop.f32.mrf.mxu1 }
 0x3ad   : > { %v1339_v56 = vpop.eup %1338 }
 0x3ae   : > { %v815_v57 = vadd.f32 1.0, %v1339_v56 }
 0x3b0   : > { %1340 = vrcp.f32 %v815_v57  ;;  %v827_v61 = vand.u32 2147483648, %v815_v57  ;;  %v825_v63 = vand.u32 2147483647, %v815_v57  ;;  %vm821_vm5 = vweird.f32 %v815_v57 }
 0x3b2   : > { %v828_v1 = vor.u32 1.1754944e-38, %v827_v61  ;;  %vm826_vm7 = vcmp.eq.f32.partialorder %v825_v63, 8.507059e+37 }
 0x3b6   : > { %v1341_v58 = vpop.eup %1340 }
 0x3b7   : > { %v817_v59 = vmul.f32 %v1341_v58, %v815_v57  ;;  %vm822_vm4 = vweird.f32 %v1341_v58 }
 0x3b8   : > { %vm823_vm6 = vmor %vm821_vm5, %vm822_vm4 }
 0x3b9   : > { %v818_v60 = vsub.f32 1.0, %v817_v59 }
 0x3bb   : > { %v819_v62 = vmul.f32 %v1341_v58, %v818_v60 }
 0x3bd   : > { %v820_v0 = vadd.f32 %v1341_v58, %v819_v62 }
 0x3bf   : > { %v824_v2 = vsel %vm823_vm6, %v1341_v58, %v820_v0 }
 0x3c0   : > { %v829_v3 = vsel %vm826_vm7, %v828_v1, %v824_v2 }
 0x3c1   : > { %v831_v4 = vmul.f32 %v829_v3, %v809_v53 }
 0x3c3   : > { %v832_v5 = vadd.f32 %v831_v4, %v1935_v23 }
 0x3c5   : > { %v833_v6 = vsel %vm676_vm2, %v832_v5, 0.0 }
 0x3c6   : > { %834 = vadd.xlane.f32.xlu1 %v833_v6 }
 0x439   : > { %v835_v7 = vpop.xlane.xlu1 %834 }
 0x43a   : > { %v836_v8 = vmul.f32 %v835_v7, %v1925_v38 }
 0x43c   : > { %v837_v9 = vsub.f32 %v832_v5, %v836_v8 }
 0x43e   : > { %v838_v10 = vmul.f32 %v837_v9, %v837_v9 }
 0x440   : > { %v839_v11 = vsel %vm676_vm2, %v838_v10, 0.0 }
 0x441   : > { %840 = vadd.xlane.f32.xlu2 %v839_v11 }
 0x4b4   : > { %v841_v15 = vpop.xlane.xlu2 %840 }
 0x4b5   : > { %v842_v16 = vmul.f32 %v841_v15, %v1925_v38 }
 0x4b7   : > { %v843_v17 = vadd.f32 1e-05, %v842_v16 }
 0x4b9   : > { %1342 = vrsqrt.f32 %v843_v17  ;;  %vm850_vm9 = vweird.f32 %v843_v17 }
 0x4bf   : > { %v1343_v18 = vpop.eup %1342 }
 0x4c0   : > { %v845_v19 = vmul.f32 %v1343_v18, %v843_v17  ;;  %vm851_vm8 = vweird.f32 %v1343_v18 }
 0x4c1   : > { %vm852_vm10 = vmor %vm850_vm9, %vm851_vm8 }
 0x4c2   : > { %v846_v20 = vmul.f32 %v1343_v18, %v845_v19 }
 0x4c4   : > { %v847_v21 = vmul.f32 0.5, %v846_v20 }
 0x4c6   : > { %v848_v22 = vsub.f32 1.5, %v847_v21 }
 0x4c8   : > { %v849_v23 = vmul.f32 %v1343_v18, %v848_v22 }
 0x4ca   : > { %v853_v25 = vsel %vm852_vm10, %v1343_v18, %v849_v23 }
 0x4cb   : > { %v854_v26 = vmul.f32 %v853_v25, %v837_v9 }
 0x4cd   : > { %v856_v28 = vmul.f32 %v855_v24, %v854_v26 }
 0x4cf   : > { %v858_v29 = vadd.f32 %v857_v27, %v856_v28 }
 0x4d1   : > { %v859_v38 = vpack.c.bf16 %v858_v29, %v858_v29 }
 0x4d3   : > { %1184 = vmatmul.msk.bf16.vlgmr.msra.gmra.mxu2 %vm676_vm2, %v859_v38 }
 0x556   : > { %v889_v31 = vpop.f32.mrf.mxu2 }
 0x557   : > { %v890_v32 = vadd.f32 %v889_v31, %v864_v30 }
 0x559   : > { %v1185_v33 = vmul.f32 -1.442695, %v890_v32 }
 0x55b   : > { %1344 = vpow2.f32 %v1185_v33 }
 0x55e   : > { %v891_v34 = vpop.f32.mrf.mxu2 }
 0x561   : > { %v1345_v35 = vpop.eup %1344 }
 0x562   : > { %v896_v36 = vadd.f32 1.0, %v1345_v35 }
 0x564   : > { %1346 = vrcp.f32 %v896_v36  ;;  %v908_v41 = vand.u32 2147483648, %v896_v36  ;;  %v906_v43 = vand.u32 2147483647, %v896_v36  ;;  %vm902_vm12 = vweird.f32 %v896_v36 }
 0x566   : > { %v909_v44 = vor.u32 1.1754944e-38, %v908_v41  ;;  %vm907_vm14 = vcmp.eq.f32.partialorder %v906_v43, 8.507059e+37 }
 0x56a   : > { %v1347_v37 = vpop.eup %1346 }
 0x56b   : > { %v898_v39 = vmul.f32 %v1347_v37, %v896_v36  ;;  %vm903_vm11 = vweird.f32 %v1347_v37 }
 0x56c   : > { %vm904_vm13 = vmor %vm902_vm12, %vm903_vm11 }
 0x56d   : > { %v899_v40 = vsub.f32 1.0, %v898_v39 }
 0x56f   : > { %v900_v42 = vmul.f32 %v1347_v37, %v899_v40 }
 0x571   : > { %v901_v12 = vadd.f32 %v1347_v37, %v900_v42 }
 0x573   : > { %v905_v45 = vsel %vm904_vm13, %v1347_v37, %v901_v12 }
 0x574   : > { %v910_v46 = vsel %vm907_vm14, %v909_v44, %v905_v45 }
 0x575   : > { %v912_v47 = vmul.f32 %v910_v46, %v890_v32 }
 0x577   : > { %v913_v48 = vadd.f32 %v912_v47, %v832_v5 }
 0x579   : > { %914 = vst.msk [vmem:[%s1891_s18] sm:$0xff] %vm676_vm2, %v913_v48 }
 0x57a   : > { %1495 = shalt.err (!%p1492_p8)
}
 0x57b   : > { %1208 = dma.vmem_to_hbm [thread:$0]  (%p1749_p12), %s929_s28, 128, %s931_s13, %s916_s20  }
 0x57c PF: > { %s2086_s18 = sld [smem:[#allocation20_spill]] }
 0x57d   : > { %s2087_s5 = sld [smem:[#allocation16_spill]] }
 0x582   : > { %p1228_p9 = scmp.ge.s32.totalorder %s2086_s18, 2 }
 0x583   : > { %s942_s22 = sand.u32 1, %s2087_s5  }
 0x584   : > { %p1224_p11 = pnand %p1228_p9, %p1753_p13  ;;  %s943_s3 = scalar_lea.sflag [#allocation4], %s942_s22 }
 0x586   : > { %p1225_p6 = pneg %p1224_p11 }
 0x588   : > { %1557 = dma.done.wait (%p1225_p6), %s943_s3, 128  }
 0x589   : > { %1559 = vsyncadd (%p1225_p6), %s943_s3, 4294967168  ;;  %s32_s23 = sadd.s32 1, %s2086_s18   ;;  %s2089_s24 = sld [smem:[#allocation17_spill]] }
 0x58a   : > { %p29_p1 = scmp.ge.s32.totalorder %s32_s23, 8   ;;  %s2090_s18 = sld [smem:[#allocation25_spill]] }
 0x58b   : > { %s2091_s19 = sld [smem:[#allocation18_spill]]  ;;  %s2095_s13 = smov %s1566_s14 }
 0x58c   : > { %s2092_s20 = sld [smem:[#allocation19_spill]]  ;;  %s2096_s14 = smov %s1570_s15 }
 0x58d   : > { %s2093_s21 = sld [smem:[#allocation23_spill]]  ;;  %s2097_s15 = smov %s1812_s7 }
 0x58e   : > { %s2094_s22 = sld [smem:[#allocation24_spill]]  ;;  %s2098_s16 = smov %s1578_s17 }
 0x58f   : > { %s2099_s17 = smov %s2089_s24  ;;  %31 = sbr.rel (!%p29_p1) target bundleno = 25 (0x19), region = 158 }
 0x594   :  { %949 = vsyncpa [#allocation3], 1 }
 0x595   :  { %951 = vsyncpa [#allocation3 + $0x1], 1 }
 0x596   :  { %952 = vsyncpa [#allocation6], 1 }
 0x597   :  { %954 = vsyncpa [#allocation6 + $0x1], 1 }
 0x598   :  { %955 = vsyncpa [#allocation9], 1 }
 0x599   :  { %957 = vsyncpa [#allocation9 + $0x1], 1 }
 0x59a   :  { %958 = vsyncpa [#allocation4], 1 }
 0x59b   :  { %960 = vsyncpa [#allocation4 + $0x1], 1 }

</bundles_post_ra>
